<compile_context>
chip_gen: v6e
topology: v6e:2x2x1
jax: 0.10.0
libtpu: 0.0.40
codegen_flags: <defaults>
</compile_context>

<pallas_src>
import jax
import jax.numpy as jnp
from jax.experimental import pallas as pl
from jax.experimental.pallas import tpu as pltpu

IN_DIM, HID_DIM, OUT_DIM = 10, 20, 2
BN_EPS = 1e-5
# Comfortably above the ~20 MiB peak at the default tile, below v7x's 64 MiB
# physical VMEM (v5e/v6e have 128 MiB).
_VMEM_LIMIT = 48 * 1024 * 1024


def _round_up(x, m):
    return (x + m - 1) // m * m


def _ceil_div(a, b):
    return -(-a // b)


# --------------------------- pass 1: BN statistics ---------------------------
def _stats_kernel(xT_ref, w1_ref, sum_ref, sumsq_ref):
    """Accumulate per-feature sum / sumsq of (W1 @ x) over batch tiles.

    Grid = (2, n_per_core): leading axis is "parallel" (v7x megacore split),
    inner axis is "arbitrary" (accumulation).  Each partition c owns its own
    [1, 20, 1] accumulator block; partials are reduced on the host.
    """
    @pl.when(pl.program_id(1) == 0)
    def _():
        sum_ref[...] = jnp.zeros_like(sum_ref)
        sumsq_ref[...] = jnp.zeros_like(sumsq_ref)

    x = xT_ref[...]                                                  # [10, Bt]
    h = jnp.dot(w1_ref[...].astype(x.dtype), x,
                preferred_element_type=jnp.float32)                  # [20, Bt] f32
    sum_ref[...] += jnp.sum(h, axis=1, keepdims=True)[None]          # [1, 20, 1]
    sumsq_ref[...] += jnp.sum(h * h, axis=1, keepdims=True)[None]    # [1, 20, 1]


# ------------------- pass 2: (BN-folded) FC1 + ReLU + FC2 --------------------
def _forward_kernel(xT_ref, w1f_ref, b1f_ref, w2_ref, b2_ref, oT_ref):
    x = xT_ref[...]                                                  # [10, Bt]
    h = jnp.dot(w1f_ref[...].astype(x.dtype), x,
                preferred_element_type=jnp.float32) + b1f_ref[...]   # BN folded
    h = jnp.maximum(h, 0.0)                                          # ReLU
    oT_ref[...] = (jnp.dot(w2_ref[...], h,
                           preferred_element_type=jnp.float32)
                   + b2_ref[...]).astype(oT_ref.dtype)               # [2, Bt]


def attack_model_forward(x, w1, b1, gamma, beta, w2, b2,
                         *, b_tile=65536, x_hbm_dtype=jnp.bfloat16):
    """x: [B, 10] f32.  Weights in PyTorch layout: w1 [20,10], b1 [20,1],
    gamma/beta [20,1], w2 [2,20], b2 [2,1].  Returns [B, 2] f32.

    x_hbm_dtype: dtype x is streamed through HBM in (default bf16 to halve the
    dominant memory traffic; use jnp.float32 for exact f32 semantics).
    """
    B = x.shape[0]
    assert x.shape[1] == IN_DIM
    if x_hbm_dtype is None:
        x_hbm_dtype = jnp.float32

    # Balanced, even number of batch tiles (even so pass 1 can split across
    # two TensorCores on v7x).  tile is a multiple of 128 (lane-aligned) and
    # padding waste is bounded to < 128 columns per tile.
    b_tile = max(int(b_tile), 128)
    n_tiles = max(2, _ceil_div(B, b_tile))
    n_tiles += n_tiles % 2
    tile = _round_up(_ceil_div(B, n_tiles), 128)
    b_pad = n_tiles * tile
    n_per_core = n_tiles // 2

    # Single fused XLA pre-pass: transpose + (bf16) cast + zero pad.
    xT = x.T.astype(x_hbm_dtype)                                     # [10, B]
    if b_pad != B:
        xT = jnp.pad(xT, ((0, 0), (0, b_pad - B)))

    # ---- pass 1: per-feature sum / sumsq of W1 @ x over the batch ----------
    s3, ss3 = pl.pallas_call(
        _stats_kernel,
        out_shape=(jax.ShapeDtypeStruct((2, HID_DIM, 1), jnp.float32),
                   jax.ShapeDtypeStruct((2, HID_DIM, 1), jnp.float32)),
        grid=(2, n_per_core),
        in_specs=[pl.BlockSpec((IN_DIM, tile),
                               lambda c, i: (0, c * n_per_core + i)),
                  pl.BlockSpec((HID_DIM, IN_DIM), lambda c, i: (0, 0))],
        out_specs=(pl.BlockSpec((1, HID_DIM, 1), lambda c, i: (c, 0, 0)),
                   pl.BlockSpec((1, HID_DIM, 1), lambda c, i: (c, 0, 0))),
        compiler_params=pltpu.CompilerParams(
            dimension_semantics=("parallel", "arbitrary"),
            vmem_limit_bytes=_VMEM_LIMIT),
    )(xT, w1)
    s = jnp.sum(s3, axis=0)                                          # [20, 1]
    ss = jnp.sum(ss3, axis=0)                                        # [20, 1]

    # Fold BN (training-mode batch stats, biased variance) into FC1 weights.
    # Note: stats were accumulated on W1 @ x (bias excluded); mean_h = s/B + b1
    # and the variance is unchanged by the bias shift.
    mean_wx = s / B
    var = jnp.maximum(ss / B - mean_wx * mean_wx, 0.0)
    rstd = jax.lax.rsqrt(var + BN_EPS)
    scale = gamma * rstd                                             # [20, 1]
    shift = beta - (mean_wx + b1) * scale                            # [20, 1]
    w1f = w1 * scale                                                 # [20, 10]
    b1f = b1 * scale + shift                                         # [20, 1]

    # ---- pass 2: relu(W1' x + b1') -> W2 h + b2 -----------------------------
    oT = pl.pallas_call(
        _forward_kernel,
        out_shape=jax.ShapeDtypeStruct((OUT_DIM, b_pad), jnp.float32),
        grid=(n_tiles,),
        in_specs=[pl.BlockSpec((IN_DIM, tile), lambda i: (0, i)),
                  pl.BlockSpec((HID_DIM, IN_DIM), lambda i: (0, 0)),
                  pl.BlockSpec((HID_DIM, 1), lambda i: (0, 0)),
                  pl.BlockSpec((OUT_DIM, HID_DIM), lambda i: (0, 0)),
                  pl.BlockSpec((OUT_DIM, 1), lambda i: (0, 0))],
        out_specs=pl.BlockSpec((OUT_DIM, tile), lambda i: (0, i)),
        compiler_params=pltpu.CompilerParams(
            dimension_semantics=("parallel",),
            vmem_limit_bytes=_VMEM_LIMIT),
    )(xT, w1f, b1f, w2, b2)

    # Match PyTorch's [B, 2] output layout.  (Callers that can consume the
    # lane-dense [2, B] layout directly should take oT[:, :B] instead.)
    return oT[:, :B].T


# ------------------------------ reference / init -----------------------------
def attack_model_reference(x, w1, b1, gamma, beta, w2, b2):
    h = x @ w1.T + b1[:, 0]
    mean = jnp.mean(h, axis=0, keepdims=True)
    var = jnp.mean((h - mean) ** 2, axis=0, keepdims=True)
    h = (h - mean) * jax.lax.rsqrt(var + BN_EPS)
    h = h * gamma[:, 0] + beta[:, 0]
    h = jnp.maximum(h, 0.0)
    return h @ w2.T + b2[:, 0]


def init_params(key):
    """Deterministic init mimicking PyTorch defaults, in PyTorch [out,in] layout."""
    k1, k2, k3, k4 = jax.random.split(key, 4)
    bound1 = 1.0 / jnp.sqrt(IN_DIM)
    w1 = jax.random.uniform(k1, (HID_DIM, IN_DIM), jnp.float32, -bound1, bound1)
    b1 = jax.random.uniform(k2, (HID_DIM, 1), jnp.float32, -bound1, bound1)
    gamma = jnp.ones((HID_DIM, 1), jnp.float32)    # BatchNorm1d weight
    beta = jnp.zeros((HID_DIM, 1), jnp.float32)    # BatchNorm1d bias
    bound2 = 1.0 / jnp.sqrt(HID_DIM)
    w2 = jax.random.uniform(k3, (OUT_DIM, HID_DIM), jnp.float32, -bound2, bound2)
    b2 = jax.random.uniform(k4, (OUT_DIM, 1), jnp.float32, -bound2, bound2)
    return w1, b1, gamma, beta, w2, b2


if __name__ == "__main__":
    key = jax.random.PRNGKey(0)
    k_x, k_p = jax.random.split(key)

    B = 8
    x = jax.random.normal(k_x, (B, IN_DIM), jnp.float32)
    params = init_params(k_p)

    ref = attack_model_reference(x, *params)

    # Default fast path: x streamed as bf16.
    out = attack_model_forward(x, *params)
    jax.block_until_ready(out)
    assert out.shape == (B, OUT_DIM) and out.dtype == jnp.float32
    assert jnp.allclose(out, ref, atol=2e-2, rtol=2e-2), \
        f"bf16 path max abs err {float(jnp.max(jnp.abs(out - ref)))}"

    # Exact path: x streamed as f32.
    out_f32 = attack_model_forward(x, *params, x_hbm_dtype=jnp.float32)
    jax.block_until_ready(out_f32)
    assert jnp.allclose(out_f32, ref, atol=1e-4, rtol=1e-4), \
        f"f32 path max abs err {float(jnp.max(jnp.abs(out_f32 - ref)))}"

    print("KERNEL_OK")
</pallas_src>

<mosaic_0001>
module attributes {stable_mosaic.version = 11 : i64} {
  func.func @_stats_kernel(%arg0: i32, %arg1: i32, %arg2: memref<10x128xbf16, #tpu.memory_space<vmem>>, %arg3: memref<20x10xf32, #tpu.memory_space<vmem>>, %arg4: memref<1x20x1xf32, #tpu.memory_space<vmem>>, %arg5: memref<1x20x1xf32, #tpu.memory_space<vmem>>) attributes {dimension_semantics = [#tpu.dimension_semantics<parallel>, #tpu.dimension_semantics<arbitrary>], iteration_bounds = array<i64: 2, 1>, scalar_prefetch = 0 : i64, scratch_operands = 0 : i64, tpu.core_type = #tpu.core_type<tc>, window_params = [{transform_indices = @transform_0, window_bounds = array<i64: 10, 128>}, {pipeline_mode = #tpu.pipeline_mode<synchronous>, transform_indices = @transform_1, window_bounds = array<i64: 20, 10>}, {transform_indices = @transform_2, window_bounds = array<i64: 1, 20, 1>}, {transform_indices = @transform_3, window_bounds = array<i64: 1, 20, 1>}]} {
    %c0_i32 = arith.constant 0 : i32
    %0 = arith.cmpi eq, %arg1, %c0_i32 : i32
    %1 = arith.extui %0 : i1 to i32
    %c0_i32_0 = arith.constant 0 : i32
    %2 = arith.cmpi ne, %1, %c0_i32_0 : i32
    scf.if %2 {
      %cst_18 = arith.constant 0.000000e+00 : f32
      %20 = vector.broadcast %cst_18 : f32 to vector<1x20x1xf32>
      %c0_19 = arith.constant 0 : index
      %c0_20 = arith.constant 0 : index
      %c0_21 = arith.constant 0 : index
      %21 = vector.load %arg4[%c0_19, %c0_20, %c0_21] : memref<1x20x1xf32, #tpu.memory_space<vmem>>, vector<1x20x1xf32>
      tpu.vector_store %arg4[%c0_19, %c0_20, %c0_21], %20 {strides = array<i32>} : memref<1x20x1xf32, #tpu.memory_space<vmem>>, vector<1x20x1xf32>,
      %cst_22 = arith.constant 0.000000e+00 : f32
      %22 = vector.broadcast %cst_22 : f32 to vector<1x20x1xf32>
      %c0_23 = arith.constant 0 : index
      %c0_24 = arith.constant 0 : index
      %c0_25 = arith.constant 0 : index
      %23 = vector.load %arg5[%c0_23, %c0_24, %c0_25] : memref<1x20x1xf32, #tpu.memory_space<vmem>>, vector<1x20x1xf32>
      tpu.vector_store %arg5[%c0_23, %c0_24, %c0_25], %22 {strides = array<i32>} : memref<1x20x1xf32, #tpu.memory_space<vmem>>, vector<1x20x1xf32>,
    } else {
    }
    %c0 = arith.constant 0 : index
    %c0_1 = arith.constant 0 : index
    %3 = vector.load %arg2[%c0, %c0_1] : memref<10x128xbf16, #tpu.memory_space<vmem>>, vector<10x128xbf16>
    %c0_2 = arith.constant 0 : index
    %c0_3 = arith.constant 0 : index
    %4 = vector.load %arg3[%c0_2, %c0_3] : memref<20x10xf32, #tpu.memory_space<vmem>>, vector<20x10xf32>
    %5 = arith.truncf %4 : vector<20x10xf32> to vector<20x10xbf16>
    %cst = arith.constant dense<0.000000e+00> : vector<20x128xf32>
    %6 = tpu.matmul %5, %3, %cst {dimension_numbers = #tpu.dot_dimension_numbers<[1], [0], [0], [1], [0, 0, 1, 1], [], []>} : vector<20x10xbf16>, vector<10x128xbf16>, vector<20x128xf32> -> vector<20x128xf32>
    %c0_4 = arith.constant 0 : index
    %c0_5 = arith.constant 0 : index
    %c0_6 = arith.constant 0 : index
    %7 = vector.load %arg4[%c0_4, %c0_5, %c0_6] : memref<1x20x1xf32, #tpu.memory_space<vmem>>, vector<1x20x1xf32>
    %cst_7 = arith.constant dense<0.000000e+00> : vector<20xf32>
    %8 = vector.multi_reduction <add>, %6, %cst_7 [1] : vector<20x128xf32> to vector<20xf32>
    %9 = vector.shape_cast %8 : vector<20xf32> to vector<20x1xf32>
    %10 = vector.shape_cast %9 : vector<20x1xf32> to vector<1x20x1xf32>
    %11 = arith.addf %7, %10 : vector<1x20x1xf32>
    %c0_8 = arith.constant 0 : index
    %c0_9 = arith.constant 0 : index
    %c0_10 = arith.constant 0 : index
    %12 = vector.load %arg4[%c0_8, %c0_9, %c0_10] : memref<1x20x1xf32, #tpu.memory_space<vmem>>, vector<1x20x1xf32>
    tpu.vector_store %arg4[%c0_8, %c0_9, %c0_10], %11 {strides = array<i32>} : memref<1x20x1xf32, #tpu.memory_space<vmem>>, vector<1x20x1xf32>,
    %c0_11 = arith.constant 0 : index
    %c0_12 = arith.constant 0 : index
    %c0_13 = arith.constant 0 : index
    %13 = vector.load %arg5[%c0_11, %c0_12, %c0_13] : memref<1x20x1xf32, #tpu.memory_space<vmem>>, vector<1x20x1xf32>
    %14 = arith.mulf %6, %6 : vector<20x128xf32>
    %cst_14 = arith.constant dense<0.000000e+00> : vector<20xf32>
    %15 = vector.multi_reduction <add>, %14, %cst_14 [1] : vector<20x128xf32> to vector<20xf32>
    %16 = vector.shape_cast %15 : vector<20xf32> to vector<20x1xf32>
    %17 = vector.shape_cast %16 : vector<20x1xf32> to vector<1x20x1xf32>
    %18 = arith.addf %13, %17 : vector<1x20x1xf32>
    %c0_15 = arith.constant 0 : index
    %c0_16 = arith.constant 0 : index
    %c0_17 = arith.constant 0 : index
    %19 = vector.load %arg5[%c0_15, %c0_16, %c0_17] : memref<1x20x1xf32, #tpu.memory_space<vmem>>, vector<1x20x1xf32>
    tpu.vector_store %arg5[%c0_15, %c0_16, %c0_17], %18 {strides = array<i32>} : memref<1x20x1xf32, #tpu.memory_space<vmem>>, vector<1x20x1xf32>,
    return
  }
  func.func @transform_0(%arg0: i32, %arg1: i32) -> (i32, i32) {
    %c1_i32 = arith.constant 1 : i32
    %0 = arith.muli %arg0, %c1_i32 : i32
    %1 = arith.addi %0, %arg1 : i32
    %c0_i32 = arith.constant 0 : i32
    %c0_i32_0 = arith.constant 0 : i32
    return %c0_i32, %1 : i32, i32
  }
  func.func @transform_1(%arg0: i32, %arg1: i32) -> (i32, i32) {
    %c0_i32 = arith.constant 0 : i32
    %c0_i32_0 = arith.constant 0 : i32
    %c0_i32_1 = arith.constant 0 : i32
    return %c0_i32, %c0_i32_0 : i32, i32
  }
  func.func @transform_2(%arg0: i32, %arg1: i32) -> (i32, i32, i32) {
    %c0_i32 = arith.constant 0 : i32
    %c0_i32_0 = arith.constant 0 : i32
    %c0_i32_1 = arith.constant 0 : i32
    return %arg0, %c0_i32, %c0_i32_0 : i32, i32, i32
  }
  func.func @transform_3(%arg0: i32, %arg1: i32) -> (i32, i32, i32) {
    %c0_i32 = arith.constant 0 : i32
    %c0_i32_0 = arith.constant 0 : i32
    %c0_i32_1 = arith.constant 0 : i32
    return %arg0, %c0_i32, %c0_i32_0 : i32, i32, i32
  }
}

</mosaic_0001>

<bundles_post_ra>
// kernel: tpu_custom_call.1
= control target key start
LH: loop header
LB: loop body
LE: loop exit
PB: predicated region body
PF: predicated region fallthrough
CT: control target
= control target key end

     0   :  { %s601_s12 = smov 0   ;;  %s603_s13 = smov 0   ;;  %s715_s0 = inlined_call_operand.vmem [shape: bf16[10,256], index: 0, kind: input, shape index: {}]   ;;  %s716_s1 = inlined_call_operand.vmem [shape: f32[20,10], index: 1, kind: input, shape index: {}]   ;;  %s717_s2 = inlined_call_operand.vmem [shape: f32[2,20,1], index: 2, kind: output, shape index: {0}]   ;;  %s718_s3 = inlined_call_operand.vmem [shape: f32[2,20,1], index: 3, kind: output, shape index: {1}]  }
   0x1   :  { %s605_s14 = smov 0   ;;  %s607_s15 = smov 0  }
   0x2   :  { %s609_s16 = smov 0  }
   0x3 LB: > { %s26_s17 = sadd.s32 1, %s574_s15  ;;  %p42_p1 = scmp.ne.s32.totalorder %s566_s13, %s562_s12  ;;  %s578_s16 = sphi %s609_s16, %s14_s16   ;;  %s574_s15 = sphi %s607_s15, %s722_s15   ;;  %s570_s14 = sphi %s605_s14, %s721_s14   ;;  %s566_s13 = sphi %s603_s13, %s720_s13   ;;  %s562_s12 = sphi %s601_s12, %s719_s12  }
   0x4   : > { %p28_p0 = scmp.ge.s32.totalorder %s26_s17, 2  ;;  %p43_p2 = scmp.eq.s32.totalorder %s578_s16, 0 }
   0x5   : > { %s35_s19 = sadd.s32 1, %s566_s13  ;;  %p475_p5 = scmp.ge.s32.totalorder %s578_s16, 2 }
   0x6   : > { %s724_s17 = smov (%p28_p0, %s26_s17), 0  ;;  %p44_p3 = por %p43_p2, %p42_p1 }
   0x7   : > { %s32_s18 = ssub.s32 %s574_s15, %s724_s17  ;;  %144 = sbr.rel (%p475_p5) target bundleno = 17 (0x11), region = 20 }
   0x8   : > { %p33_p4 = scmp.eq.s32.totalorder %s32_s18, 0 }
   0xa   : > { %s636_s20 = scalar_select %p33_p4, %s566_s13, %s35_s19  }
   0xc   : > { %147 = sbr.rel (!%p44_p3) target bundleno = 17 (0x11), region = 24  ;;  %s149_s21 = sand.u32 (%p44_p3), 1, %s566_s13  }
   0xd   : > { %s477_s22 = sshll.u32 (%p44_p3), %s574_s15, 2  ;;  %s476_s23 = sshll.u32 (%p44_p3), %s149_s21, 3 }
   0xe   : > { %s154_s26 = scalar_lea.vmem (%p44_p3), %s715_s0, %s477_s22  ;;  %s151_s27 = scalar_lea.vmem (%p44_p3), [#allocation2], %s476_s23 }
   0xf   : > { %v171_v0 = vld [vmem:[%s154_s26] sm:$0xf] (%p44_p3)  ;;  %v173_v1 = vld [vmem:[%s154_s26 + $0x8] sm:$0xf] (%p44_p3) }
  0x10   : > { %172 = vst [vmem:[%s151_s27] sm:$0xf] (%p44_p3), %v171_v0  ;;  %174 = vst [vmem:[%s151_s27 + $0x4] sm:$0xf] (%p44_p3), %v173_v1 }
  0x11 PF: > { %p478_p6 = scmp.ge.s32.totalorder %s578_s16, 1  ;;  %p201_p7 = scmp.lt.s32.totalorder %s578_s16, 3 }
  0x13   : > { %p202_p8 = pnand %p478_p6, %p201_p7 }
  0x14   : > { %s208_s28 = sand.u32 (!%p202_p8), 1, %s562_s12   ;;  %p237_p9 = scmp.lt.s32.totalorder (!%p202_p8), %s570_s14, 1 }
  0x15   : > { %205 = sbr.rel (%p202_p8) target bundleno = 376 (0x178), region = 65  ;;  %s479_s6 = sshll.u32 (!%p202_p8), %s208_s28, 3 }
  0x16   : > { %s210_s9 = scalar_lea.vmem (!%p202_p8), [#allocation2], %s479_s6 }
  0x1a   : > { %v262_v2 = vld [vmem:[%s716_s1] sm:$0xff]  ;;  %v263_v3 = vld [vmem:[%s716_s1 + $0x8] sm:$0xff]  ;;  %vm272_vm0 = vcmask 80896   ;;  %vm279_vm1 = vcmask 1044480   ;;  %v264_v5 = vld [vmem:[%s716_s1 + $0x10] sm:$0xf] }
  0x1b   : > { %v265_v4 = vpack.c.bf16 %v263_v3, %v262_v2  ;;  %v539_v6 = vld [vmem:[%s210_s9] sm:$0x1f]   ;;  %v266_v8 = vpack.c.bf16 %v264_v5, %v264_v5  ;;  %s726_s14 = smov (!%p237_p9, %s570_s14), 1  ;;  %vm255_vm2 = vcmask 3072   ;;  %v580_v9 = vmov 0.0  }
  0x1c   : > { %496 = vmatprep.subr.msk.bf16.mxu0 %vm279_vm1, %v539_v6  ;;  %v281_v7 = vsel %vm279_vm1, %v539_v6, 0  ;;  %s497_s10 = smul.u32 24, %s726_s14  ;;  %vm338_vm3 = vcmask 1043456   ;;  %vm252_vm4 = vcmask 7168  }
  0x1d   : > { %492 = vmatprep.mubr.msk.bf16.mxu0 %vm272_vm0, %v265_v4  ;;  %491 = vmatpush3.bf16.msra.mxu0 %v281_v7 }
  0x1e   : > { %s661_s18 = scalar_lea.vmem %s717_s2, %s497_s10  ;;  %s673_s21 = scalar_lea.vmem %s718_s3, %s497_s10 }
  0x1f   : > { %256 = vst.msk [vmem:[%s661_s18 + $0x10] sm:$0xf] %vm255_vm2, %v580_v9  ;;  %259 = vst.msk [vmem:[%s673_s21 + $0x10] sm:$0xf] %vm255_vm2, %v580_v9 }
  0x20   : > { %493 = vmatmul.mubr.msk.bf16.vlgmr.msra.gmra.mxu0 %vm272_vm0, %v266_v8  ;;  %253 = vst.msk [vmem:[%s661_s18] sm:$0xff] %vm252_vm4, %v580_v9  ;;  %254 = vst.msk [vmem:[%s661_s18 + $0x8] sm:$0xff] %vm252_vm4, %v580_v9 }
  0x21   : > { %257 = vst.msk [vmem:[%s673_s21] sm:$0xff] %vm252_vm4, %v580_v9  ;;  %258 = vst.msk [vmem:[%s673_s21 + $0x8] sm:$0xff] %vm252_vm4, %v580_v9 }
  0x26   : > { %v333_v19 = vld [vmem:[%s661_s18 + $0x10] sm:$0xf] }
  0x27   : > { %v331_v20 = vld [vmem:[%s661_s18] sm:$0xff]  ;;  %v332_v26 = vld [vmem:[%s661_s18 + $0x8] sm:$0xff]  ;;  %v352_v31 = vld [vmem:[%s673_s21 + $0x10] sm:$0xf] }
  0x28   : > { %v350_v25 = vld [vmem:[%s673_s21] sm:$0xff]  ;;  %v351_v32 = vld [vmem:[%s673_s21 + $0x8] sm:$0xff] }
  0xe0   : > { %v494_v10 = vpop.f32.mrf.mxu0 }
  0xe1   : > { %v339_v11 = vsel %vm338_vm3, %v494_v10, 0.0  ;;  %v355_v15 = vmul.f32 %v494_v10, %v494_v10 }
  0xe2   : > { %340 = vadd.xlane.f32.xlu1 %v339_v11  ;;  %v317_v12 = vpop.f32.mrf.mxu0 }
  0xe3   : > { %334 = vadd.xlane.f32.xlu0 %v317_v12  ;;  %v353_v13 = vmul.f32 %v317_v12, %v317_v12  ;;  %v360_v18 = vsel %vm338_vm3, %v355_v15, 0.0 }
  0xe4   : > { %v495_v14 = vpop.f32.mrf.mxu0 }
  0xe6   : > { %356 = vadd.xlane.f32.xlu1 %v353_v13  ;;  %v320_v16 = vpop.f32.mrf.mxu0 }
  0xe7   : > { %336 = vadd.xlane.f32.xlu0 %v320_v16  ;;  %v354_v17 = vmul.f32 %v320_v16, %v320_v16 }
  0xea   : > { %361 = vadd.xlane.f32.xlu1 %v360_v18 }
  0xeb   : > { %358 = vadd.xlane.f32.xlu0 %v354_v17 }
 0x16b   : > { %v341_v21 = vpop.xlane.xlu1 %340 }
 0x16c   : > { %v344_v22 = vadd.f32 %v341_v21, %v333_v19  ;;  %v335_v23 = vpop.xlane.xlu0 %334 }
 0x16d   : > { %v342_v24 = vadd.f32 %v335_v23, %v331_v20 }
 0x16e   : > { %349 = vst.msk [vmem:[%s661_s18 + $0x10] sm:$0xf] %vm255_vm2, %v344_v22 }
 0x16f   : > { %346 = vst.msk [vmem:[%s661_s18] sm:$0xff] %vm252_vm4, %v342_v24  ;;  %v357_v27 = vpop.xlane.xlu1 %356 }
 0x170   : > { %v363_v28 = vadd.f32 %v357_v27, %v350_v25  ;;  %v337_v29 = vpop.xlane.xlu0 %336 }
 0x171   : > { %v343_v30 = vadd.f32 %v337_v29, %v332_v26 }
 0x172   : > { %366 = vst.msk [vmem:[%s673_s21] sm:$0xff] %vm252_vm4, %v363_v28 }
 0x173   : > { %347 = vst.msk [vmem:[%s661_s18 + $0x8] sm:$0xff] %vm252_vm4, %v343_v30  ;;  %v362_v33 = vpop.xlane.xlu1 %361 }
 0x174   : > { %v365_v34 = vadd.f32 %v362_v33, %v352_v31  ;;  %v359_v35 = vpop.xlane.xlu0 %358 }
 0x175   : > { %v364_v36 = vadd.f32 %v359_v35, %v351_v32 }
 0x176   : > { %368 = vst.msk [vmem:[%s673_s21 + $0x10] sm:$0xf] %vm255_vm2, %v365_v34 }
 0x177   : > { %367 = vst.msk [vmem:[%s673_s21 + $0x8] sm:$0xff] %vm252_vm4, %v364_v36 }
 0x178 PF: > { %s14_s16 = sadd.s32 1, %s578_s16   ;;  %s719_s12 = smov %s566_s13 }
 0x179   : > { %p11_p10 = scmp.ge.s32.totalorder %s14_s16, 4   ;;  %s720_s13 = smov %s636_s20 }
 0x17a   : > { %s721_s14 = smov %s574_s15  ;;  %s722_s15 = smov %s724_s17 }
 0x17b   :  { %13 = sbr.rel (!%p11_p10) target bundleno = 3 (0x3), region = 120 }

</bundles_post_ra>
